<compile_context>
chip_gen: v7x
topology: tpu7x:2x2x1
jax: 0.10.0
libtpu: 0.0.40
codegen_flags: <defaults>
</compile_context>

<pallas_src>
import jax
import jax.numpy as jnp
from jax.experimental import pallas as pl
from jax.experimental.pallas import tpu as pltpu


def statement_encoder_kernel(adj_ref, x_ref, w_ref, fc_ref, out_ref):
    """One grid step == one graph.

    adj_ref : [1, N, N]  bf16   normalized dense adjacency (A_hat)
    x_ref   : [1, N, F]  bf16   node features
    w_ref   : [F+H+2, H] bf16   packed [W1; b1; W2; b2]
    fc_ref  : [2H+1, Op] bf16   packed [Wfc_mean; Wfc_max; bfc], Op = padded 128
    out_ref : [1, 1, Op] f32    lane-dense output row
    """
    f_in = x_ref.shape[2]
    hidden = w_ref.shape[1]
    n_nodes = adj_ref.shape[1]

    adj = adj_ref[0]                       # [N, N] bf16
    x = x_ref[0]                           # [N, F] bf16

    # unpack GCN slab (static slices, no runtime cost)
    w1 = w_ref[0:f_in, :]                                    # [F, H] bf16
    b1 = w_ref[f_in:f_in + 1, :].astype(jnp.float32)         # [1, H] f32
    w2 = w_ref[f_in + 1:f_in + 1 + hidden, :]                # [H, H] bf16
    b2 = w_ref[f_in + 1 + hidden:f_in + 2 + hidden, :].astype(jnp.float32)

    # --- GCN layer 1: relu(A_hat @ (X @ W1) + b1) --- (bf16 MXU, f32 acc)
    h = jnp.dot(x, w1, preferred_element_type=jnp.float32)                 # [N, H]
    h = jnp.dot(adj, h.astype(adj.dtype),
                preferred_element_type=jnp.float32) + b1
    h = jnp.maximum(h, 0.0)                                                # f32

    # --- GCN layer 2: relu(A_hat @ (H @ W2) + b2) ---
    h2 = jnp.dot(h.astype(w2.dtype), w2, preferred_element_type=jnp.float32)
    h2 = jnp.dot(adj, h2.astype(adj.dtype),
                 preferred_element_type=jnp.float32) + b2
    h2 = jnp.maximum(h2, 0.0)                                              # [N, H] f32

    # --- global pooling over all nodes of this graph ---
    # mean as a [1,N] @ [N,H] matmul (rides the MXU slot); max stays on XLU.
    ones_row = jnp.full((1, n_nodes), 1.0 / n_nodes, dtype=jnp.float32)
    mean_p = jnp.dot(ones_row, h2, preferred_element_type=jnp.float32)     # [1, H]
    max_p = jnp.max(h2, axis=0, keepdims=True)                             # [1, H]

    # --- fc on concat([mean, max]) done as a split matmul (no lane concat) ---
    w_mean = fc_ref[0:hidden, :]                                           # [H, Op]
    w_max = fc_ref[hidden:2 * hidden, :]                                   # [H, Op]
    bfc = fc_ref[2 * hidden:2 * hidden + 1, :].astype(jnp.float32)         # [1, Op]

    out = (jnp.dot(mean_p.astype(w_mean.dtype), w_mean,
                   preferred_element_type=jnp.float32)
           + jnp.dot(max_p.astype(w_max.dtype), w_max,
                     preferred_element_type=jnp.float32)
           + bfc)                                                          # [1, Op]
    out_ref[0] = out.astype(out_ref.dtype)


def build_norm_adj(edge_index, num_nodes):
    """Dense D^{-1/2}(A+I)D^{-1/2} from a [2, E] edge_index (jit/vmap glue).

    Duplicate edges scatter-add (matching PyG aggregation); self loops are only
    added for nodes without an existing one (add_remaining_self_loops).
    """
    src = edge_index[0]
    dst = edge_index[1]
    # message flows src -> dst, so row = target node, col = source node
    adj = jnp.zeros((num_nodes, num_nodes), jnp.float32).at[dst, src].add(1.0)
    has_self = jnp.diagonal(adj) > 0.0
    adj = adj + jnp.eye(num_nodes, dtype=jnp.float32) * \
        jnp.where(has_self, 0.0, 1.0)[:, None]
    deg = jnp.sum(adj, axis=1)
    d_inv_sqrt = jnp.where(deg > 0, 1.0 / jnp.sqrt(deg), 0.0)
    return d_inv_sqrt[:, None] * adj * d_inv_sqrt[None, :]


@jax.jit
def statement_encoder(node_features, edge_index, params):
    """Batched forward.

    node_features : [B, N, F] f32
    edge_index    : [B, 2, E] int32
    returns       : [B, output_dim] f32
    """
    b, n, f = node_features.shape
    w1, b1, w2, b2, wfc, bfc = params
    hidden = w1.shape[1]
    out_dim = wfc.shape[1]
    o_pad = max(128, ((out_dim + 127) // 128) * 128)   # lane-dense output width

    # normalized adjacency per graph (fused into the same jit)
    adj = jax.vmap(lambda ei: build_norm_adj(ei, n))(edge_index)   # [B, N, N]

    # coalesce 6 weight tensors into 2 slabs (fewer, bigger DMAs)
    w_slab = jnp.concatenate([w1, b1, w2, b2], axis=0)             # [F+H+2, H]
    fc_slab = jnp.concatenate([wfc, bfc], axis=0)                  # [2H+1, O]
    fc_slab = jnp.pad(fc_slab, ((0, 0), (0, o_pad - out_dim)))     # [2H+1, Op]

    # bf16 operands for the MXU; accumulation / elementwise stay f32 in-kernel
    adj = adj.astype(jnp.bfloat16)
    x = node_features.astype(jnp.bfloat16)
    w_slab = w_slab.astype(jnp.bfloat16)
    fc_slab = fc_slab.astype(jnp.bfloat16)

    out_padded = pl.pallas_call(
        statement_encoder_kernel,
        out_shape=jax.ShapeDtypeStruct((b, 1, o_pad), jnp.float32),
        grid=(b,),
        in_specs=[
            pl.BlockSpec((1, n, n), lambda i: (i, 0, 0)),
            pl.BlockSpec((1, n, f), lambda i: (i, 0, 0)),
            pl.BlockSpec(w_slab.shape, lambda i: (0, 0)),    # resident across grid
            pl.BlockSpec(fc_slab.shape, lambda i: (0, 0)),   # resident across grid
        ],
        out_specs=pl.BlockSpec((1, 1, o_pad), lambda i: (i, 0, 0)),
        compiler_params=pltpu.CompilerParams(
            dimension_semantics=("parallel",)),
    )(adj, x, w_slab, fc_slab)

    return out_padded[:, 0, :out_dim]


def init_params(key, num_node_features, hidden_dim, output_dim):
    k1, k2, k3 = jax.random.split(key, 3)
    scale = 0.1
    w1 = scale * jax.random.normal(k1, (num_node_features, hidden_dim), jnp.float32)
    b1 = jnp.zeros((1, hidden_dim), jnp.float32)
    w2 = scale * jax.random.normal(k2, (hidden_dim, hidden_dim), jnp.float32)
    b2 = jnp.zeros((1, hidden_dim), jnp.float32)
    # fc input is the [mean ; max] concat -> 2 * hidden_dim
    wfc = scale * jax.random.normal(k3, (2 * hidden_dim, output_dim), jnp.float32)
    bfc = jnp.zeros((1, output_dim), jnp.float32)
    return (w1, b1, w2, b2, wfc, bfc)


if __name__ == "__main__":
    num_node_features = 8
    hidden_dim = 32
    output_dim = 16
    num_nodes = 16
    batch = 4

    key = jax.random.PRNGKey(0)
    k_x, k_p = jax.random.split(key)

    node_features = jax.random.normal(
        k_x, (batch, num_nodes, num_node_features), jnp.float32)

    # deterministic small graphs: bidirectional ring + chords, rotated per graph
    base_src = jnp.concatenate([
        jnp.arange(num_nodes),
        (jnp.arange(num_nodes) + 1) % num_nodes,
        jnp.array([0, 3, 7]),
    ])
    base_dst = jnp.concatenate([
        (jnp.arange(num_nodes) + 1) % num_nodes,
        jnp.arange(num_nodes),
        jnp.array([8, 12, 2]),
    ])
    edge_index = jnp.stack([
        jnp.stack([(base_src + g) % num_nodes, (base_dst + g) % num_nodes])
        for g in range(batch)
    ]).astype(jnp.int32)                                   # [B, 2, E]

    params = init_params(k_p, num_node_features, hidden_dim, output_dim)

    out = statement_encoder(node_features, edge_index, params)
    jax.block_until_ready(out)
    assert out.shape == (batch, output_dim)
    print("KERNEL_OK")
</pallas_src>

<mosaic_0001>
module attributes {stable_mosaic.version = 11 : i64} {
  func.func @statement_encoder_kernel(%arg0: i32, %arg1: memref<1x16x16xbf16, #tpu.memory_space<vmem>>, %arg2: memref<1x16x8xbf16, #tpu.memory_space<vmem>>, %arg3: memref<42x32xbf16, #tpu.memory_space<vmem>>, %arg4: memref<65x128xbf16, #tpu.memory_space<vmem>>, %arg5: memref<1x1x128xf32, #tpu.memory_space<vmem>>) attributes {dimension_semantics = [#tpu.dimension_semantics<parallel>], iteration_bounds = array<i64: 4>, scalar_prefetch = 0 : i64, scratch_operands = 0 : i64, tpu.core_type = #tpu.core_type<tc>, window_params = [{transform_indices = @transform_0, window_bounds = array<i64: 1, 16, 16>}, {transform_indices = @transform_1, window_bounds = array<i64: 1, 16, 8>}, {pipeline_mode = #tpu.pipeline_mode<synchronous>, transform_indices = @transform_2, window_bounds = array<i64: 42, 32>}, {pipeline_mode = #tpu.pipeline_mode<synchronous>, transform_indices = @transform_3, window_bounds = array<i64: 65, 128>}, {transform_indices = @transform_4, window_bounds = array<i64: 1, 1, 128>}]} {
    %c0 = arith.constant 0 : index
    %c0_0 = arith.constant 0 : index
    %c0_1 = arith.constant 0 : index
    %0 = vector.load %arg1[%c0, %c0_0, %c0_1] : memref<1x16x16xbf16, #tpu.memory_space<vmem>>, vector<1x16x16xbf16>
    %1 = vector.shape_cast %0 : vector<1x16x16xbf16> to vector<16x16xbf16>
    %c0_2 = arith.constant 0 : index
    %c0_3 = arith.constant 0 : index
    %c0_4 = arith.constant 0 : index
    %2 = vector.load %arg2[%c0_2, %c0_3, %c0_4] : memref<1x16x8xbf16, #tpu.memory_space<vmem>>, vector<1x16x8xbf16>
    %3 = vector.shape_cast %2 : vector<1x16x8xbf16> to vector<16x8xbf16>
    %c0_5 = arith.constant 0 : index
    %c0_6 = arith.constant 0 : index
    %4 = vector.load %arg3[%c0_5, %c0_6] : memref<42x32xbf16, #tpu.memory_space<vmem>>, vector<8x32xbf16>
    %c8 = arith.constant 8 : index
    %c0_7 = arith.constant 0 : index
    %5 = vector.load %arg3[%c8, %c0_7] : memref<42x32xbf16, #tpu.memory_space<vmem>>, vector<1x32xbf16>
    %6 = arith.extf %5 : vector<1x32xbf16> to vector<1x32xf32>
    %c9 = arith.constant 9 : index
    %c0_8 = arith.constant 0 : index
    %7 = vector.load %arg3[%c9, %c0_8] : memref<42x32xbf16, #tpu.memory_space<vmem>>, vector<32x32xbf16>
    %c41 = arith.constant 41 : index
    %c0_9 = arith.constant 0 : index
    %8 = vector.load %arg3[%c41, %c0_9] : memref<42x32xbf16, #tpu.memory_space<vmem>>, vector<1x32xbf16>
    %9 = arith.extf %8 : vector<1x32xbf16> to vector<1x32xf32>
    %cst = arith.constant dense<0.000000e+00> : vector<16x32xf32>
    %10 = tpu.matmul %3, %4, %cst {dimension_numbers = #tpu.dot_dimension_numbers<[1], [0], [0], [1], [0, 0, 1, 1], [], []>} : vector<16x8xbf16>, vector<8x32xbf16>, vector<16x32xf32> -> vector<16x32xf32>
    %11 = arith.truncf %10 : vector<16x32xf32> to vector<16x32xbf16>
    %cst_10 = arith.constant dense<0.000000e+00> : vector<16x32xf32>
    %12 = tpu.matmul %1, %11, %cst_10 {dimension_numbers = #tpu.dot_dimension_numbers<[1], [0], [0], [1], [0, 0, 1, 1], [], []>} : vector<16x16xbf16>, vector<16x32xbf16>, vector<16x32xf32> -> vector<16x32xf32>
    %13 = vector.broadcast %6 : vector<1x32xf32> to vector<16x32xf32>
    %14 = arith.addf %12, %13 : vector<16x32xf32>
    %cst_11 = arith.constant 0.000000e+00 : f32
    %15 = vector.broadcast %cst_11 : f32 to vector<16x32xf32>
    %16 = arith.maximumf %14, %15 : vector<16x32xf32>
    %17 = arith.truncf %16 : vector<16x32xf32> to vector<16x32xbf16>
    %cst_12 = arith.constant dense<0.000000e+00> : vector<16x32xf32>
    %18 = tpu.matmul %17, %7, %cst_12 {dimension_numbers = #tpu.dot_dimension_numbers<[1], [0], [0], [1], [0, 0, 1, 1], [], []>} : vector<16x32xbf16>, vector<32x32xbf16>, vector<16x32xf32> -> vector<16x32xf32>
    %19 = arith.truncf %18 : vector<16x32xf32> to vector<16x32xbf16>
    %cst_13 = arith.constant dense<0.000000e+00> : vector<16x32xf32>
    %20 = tpu.matmul %1, %19, %cst_13 {dimension_numbers = #tpu.dot_dimension_numbers<[1], [0], [0], [1], [0, 0, 1, 1], [], []>} : vector<16x16xbf16>, vector<16x32xbf16>, vector<16x32xf32> -> vector<16x32xf32>
    %21 = vector.broadcast %9 : vector<1x32xf32> to vector<16x32xf32>
    %22 = arith.addf %20, %21 : vector<16x32xf32>
    %cst_14 = arith.constant 0.000000e+00 : f32
    %23 = vector.broadcast %cst_14 : f32 to vector<16x32xf32>
    %24 = arith.maximumf %22, %23 : vector<16x32xf32>
    %cst_15 = arith.constant 6.250000e-02 : f32
    %25 = vector.broadcast %cst_15 : f32 to vector<1x16xf32>
    %cst_16 = arith.constant dense<0.000000e+00> : vector<1x32xf32>
    %26 = tpu.matmul %25, %24, %cst_16 {dimension_numbers = #tpu.dot_dimension_numbers<[1], [0], [0], [1], [0, 0, 1, 1], [], []>} : vector<1x16xf32>, vector<16x32xf32>, vector<1x32xf32> -> vector<1x32xf32>
    %cst_17 = arith.constant dense<0xFF800000> : vector<32xf32>
    %27 = vector.multi_reduction <maximumf>, %24, %cst_17 [0] : vector<16x32xf32> to vector<32xf32>
    %28 = vector.shape_cast %27 : vector<32xf32> to vector<1x32xf32>
    %c0_18 = arith.constant 0 : index
    %c0_19 = arith.constant 0 : index
    %29 = vector.load %arg4[%c0_18, %c0_19] : memref<65x128xbf16, #tpu.memory_space<vmem>>, vector<32x128xbf16>
    %c32 = arith.constant 32 : index
    %c0_20 = arith.constant 0 : index
    %30 = vector.load %arg4[%c32, %c0_20] : memref<65x128xbf16, #tpu.memory_space<vmem>>, vector<32x128xbf16>
    %c64 = arith.constant 64 : index
    %c0_21 = arith.constant 0 : index
    %31 = vector.load %arg4[%c64, %c0_21] : memref<65x128xbf16, #tpu.memory_space<vmem>>, vector<1x128xbf16>
    %32 = arith.extf %31 : vector<1x128xbf16> to vector<1x128xf32>
    %33 = arith.truncf %26 : vector<1x32xf32> to vector<1x32xbf16>
    %cst_22 = arith.constant dense<0.000000e+00> : vector<1x128xf32>
    %34 = tpu.matmul %33, %29, %cst_22 {dimension_numbers = #tpu.dot_dimension_numbers<[1], [0], [0], [1], [0, 0, 1, 1], [], []>} : vector<1x32xbf16>, vector<32x128xbf16>, vector<1x128xf32> -> vector<1x128xf32>
    %35 = arith.truncf %28 : vector<1x32xf32> to vector<1x32xbf16>
    %cst_23 = arith.constant dense<0.000000e+00> : vector<1x128xf32>
    %36 = tpu.matmul %35, %30, %cst_23 {dimension_numbers = #tpu.dot_dimension_numbers<[1], [0], [0], [1], [0, 0, 1, 1], [], []>} : vector<1x32xbf16>, vector<32x128xbf16>, vector<1x128xf32> -> vector<1x128xf32>
    %37 = arith.addf %34, %36 : vector<1x128xf32>
    %38 = arith.addf %37, %32 : vector<1x128xf32>
    %c0_24 = arith.constant 0 : index
    %c0_25 = arith.constant 0 : index
    %c0_26 = arith.constant 0 : index
    %39 = vector.load %arg5[%c0_24, %c0_25, %c0_26] : memref<1x1x128xf32, #tpu.memory_space<vmem>>, vector<1x1x128xf32>
    %40 = vector.shape_cast %39 : vector<1x1x128xf32> to vector<1x128xf32>
    %41 = vector.shape_cast %38 : vector<1x128xf32> to vector<1x1x128xf32>
    tpu.vector_store %arg5[%c0_24, %c0_25, %c0_26], %41 {strides = array<i32>} : memref<1x1x128xf32, #tpu.memory_space<vmem>>, vector<1x1x128xf32>,
    return
  }
  func.func @transform_0(%arg0: i32) -> (i32, i32, i32) {
    %c0_i32 = arith.constant 0 : i32
    %c0_i32_0 = arith.constant 0 : i32
    %c0_i32_1 = arith.constant 0 : i32
    return %arg0, %c0_i32, %c0_i32_0 : i32, i32, i32
  }
  func.func @transform_1(%arg0: i32) -> (i32, i32, i32) {
    %c0_i32 = arith.constant 0 : i32
    %c0_i32_0 = arith.constant 0 : i32
    %c0_i32_1 = arith.constant 0 : i32
    return %arg0, %c0_i32, %c0_i32_0 : i32, i32, i32
  }
  func.func @transform_2(%arg0: i32) -> (i32, i32) {
    %c0_i32 = arith.constant 0 : i32
    %c0_i32_0 = arith.constant 0 : i32
    %c0_i32_1 = arith.constant 0 : i32
    return %c0_i32, %c0_i32_0 : i32, i32
  }
  func.func @transform_3(%arg0: i32) -> (i32, i32) {
    %c0_i32 = arith.constant 0 : i32
    %c0_i32_0 = arith.constant 0 : i32
    %c0_i32_1 = arith.constant 0 : i32
    return %c0_i32, %c0_i32_0 : i32, i32
  }
  func.func @transform_4(%arg0: i32) -> (i32, i32, i32) {
    %c0_i32 = arith.constant 0 : i32
    %c0_i32_0 = arith.constant 0 : i32
    %c0_i32_1 = arith.constant 0 : i32
    return %arg0, %c0_i32, %c0_i32_0 : i32, i32, i32
  }
}

</mosaic_0001>

<bundles_post_ra>
// kernel: statement_encoder.1
= control target key start
LH: loop header
LB: loop body
LE: loop exit
PB: predicated region body
PF: predicated region fallthrough
CT: control target
= control target key end

     0   :  { %9 = vsyncpa [#allocation3], 0  ;;  %s1165_s0 = inlined_call_operand.vmem [shape: bf16[4,16,16], index: 0, kind: input, shape index: {}]   ;;  %s1166_s1 = inlined_call_operand.vmem [shape: bf16[4,16,8], index: 1, kind: input, shape index: {}]   ;;  %s1167_s2 = inlined_call_operand.vmem [shape: bf16[42,32], index: 2, kind: input, shape index: {}]   ;;  %s1168_s3 = inlined_call_operand.vmem [shape: bf16[65,128], index: 3, kind: input, shape index: {}]   ;;  %s1169_s4 = inlined_call_operand.hbm [shape: f32[4,1,128], index: 4, kind: output, shape index: {}]  }
   0x1   :  { %11 = vsyncpa [#allocation3 + $0x1], 0  ;;  %s1001_s15 = smov 0   ;;  %s1003_s16 = smov 0  }
   0x2   :  { %s1005_s17 = smov 0   ;;  %s1007_s18 = smov 0  }
   0x3 LB: > { %s1022_s19 = sadd.s32 4294967295, %s969_s18   ;;  %s756_s20 = sadd.s32 4294967294, %s969_s18   ;;  %s969_s18 = sphi %s1007_s18, %s1175_s18   ;;  %s965_s17 = sphi %s1005_s17, %s1174_s17   ;;  %s961_s16 = sphi %s1003_s16, %s1173_s16   ;;  %s957_s15 = sphi %s1001_s15, %s1172_s15  }
   0x4   : > { %s1026_s21 = sadd.s32 1, %s969_s18   ;;  %s118_s22 = sadd.s32 1, %s965_s17 }
   0x5   : > { %s115_s23 = ssub.s32 %s969_s18, %s1026_s21  ;;  %p128_p0 = scmp.ne.s32.totalorder %s965_s17, %s961_s16 }
   0x6   : > { %p116_p1 = scmp.eq.s32.totalorder %s115_s23, 0  ;;  %p129_p2 = scmp.eq.s32.totalorder %s1022_s19, 3 }
   0x7   : > { %p134_p3 = scmp.ne.s32.totalorder %s961_s16, %s957_s15  ;;  %p135_p4 = scmp.eq.s32.totalorder %s756_s20, 3 }
   0x8   : > { %s1037_s24 = scalar_select %p116_p1, %s965_s17, %s118_s22  }
   0x9   : > { %p1039_p5 = por %p129_p2, %p128_p0  ;;  %p1043_p6 = por %p135_p4, %p134_p3 }
   0xa   : > { %p759_p7 = scmp.ge.s32.totalorder %s969_s18, 1  ;;  %p175_p8 = scmp.lt.s32.totalorder %s969_s18, 5 }
   0xc   : > { %p176_p9 = pnand %p759_p7, %p175_p8 }
   0xd   : > { %v220_v0 = vld [vmem:[%s1167_s2] sm:$0xf] (!%p176_p9)  ;;  %vm238_vm0 = vcmask (!%p176_p9), 1043456   ;;  %p205_p10 = scmp.lt.s32.totalorder (!%p176_p9), %s1022_s19, 3  ;;  %v971_v1 = vmov (!%p176_p9), 0.0   ;;  %vm972_vm1 = vmmov (!%p176_p9), 0   ;;  %v284_v26 = vlaneseq (!%p176_p9) }
   0xe   : > { %179 = sbr.rel (%p176_p9) target bundleno = 1351 (0x547), region = 36  ;;  %803 = vmatprep.subr.bf16.mxu0 (!%p176_p9), %v971_v1  ;;  %v240_v2 = vsel (!%p176_p9), %vm238_vm0, %v220_v0, 0  ;;  %805 = vmatprep.mubr.msk.bf16.mxu0 (!%p176_p9), %vm972_vm1, %v971_v1  ;;  %vm234_vm2 = vcmask (!%p176_p9), 64512   ;;  %vm293_vm3 = vcmask (!%p176_p9), 130048   ;;  %v900_v10 = vld [vmem:[%s1167_s2 + $0x4] sm:$0xff] (!%p176_p9)   ;;  %v901_v11 = vld [vmem:[%s1167_s2 + $0xc] sm:$0xff] (!%p176_p9)  }
   0xf   : > { %804 = vmatpush3.bf16.msra.mxu0 (!%p176_p9), %v240_v2  ;;  %809 = vmatprep.subr.bf16.mxu1 (!%p176_p9), %v971_v1  ;;  %v358_v12 = vshll.u32 (!%p176_p9), %v900_v10, 16  ;;  %v356_v13 = vshrl.u32 (!%p176_p9), %v900_v10, 16  ;;  %v363_v15 = vshll.u32 (!%p176_p9), %v901_v11, 16  ;;  %v227_v16 = vld [vmem:[%s1167_s2 + $0x14] sm:$0x1] (!%p176_p9)  ;;  %v367_v21 = vshrl.u32 (!%p176_p9), %v901_v11, 16 }
  0x10   : > { %811 = vmatprep.mubr.msk.bf16.mxu1 (!%p176_p9), %vm972_vm1, %v971_v1  ;;  %815 = vmatprep.subr.bf16.mxu0 (!%p176_p9), %v971_v1  ;;  %v770_v19 = vcombine.low (!%p176_p9), %v227_v16, %v227_v16  ;;  %vm354_vm4 = vsmask.f32 (!%p176_p9), 7424  ;;  %v285_v27 = vshrl.u32 (!%p176_p9), %v284_v26, 7  ;;  %v221_v28 = vld [vmem:[%s1167_s2 + $0x4] sm:$0x1] (!%p176_p9)  ;;  %vm377_vm5 = vcmask (!%p176_p9), 261120  }
  0x11   : > { %v360_v14 = vrot.slane (!%p176_p9), %v358_v12, 1  ;;  %v365_v18 = vrot.slane (!%p176_p9), %v363_v15, 1  ;;  %v222_v29 = vunpack.c.l.bf16 (!%p176_p9), %v221_v28  ;;  %v973_v46 = vmov (!%p176_p9), 0.0|0.0   ;;  %v903_v47 = vld [vmem:[%s1168_s3 + $0x10] sm:$0xff] (!%p176_p9)   ;;  %v904_v48 = vld [vmem:[%s1168_s3 + $0x18] sm:$0xff] (!%p176_p9)   ;;  %v905_v0 = vld [vmem:[%s1168_s3] sm:$0xff] (!%p176_p9)  }
  0x12   : > { %v371_v22 = vshll.u32 (!%p176_p9), %v770_v19, 16  ;;  %v286_v30 = vsub.s32 (!%p176_p9), 0, %v285_v27  ;;  %v228_v49 = vunpack.c.l.bf16 (!%p176_p9), %v227_v16  ;;  %v425_v50 = vsub.s32 (!%p176_p9), 1, %v285_v27  ;;  %v906_v10 = vld [vmem:[%s1168_s3 + $0x8] sm:$0xff] (!%p176_p9)   ;;  %s780_s13 = sshll.u32 (!%p176_p9), %s1022_s19, 4 }
  0x13   : > { %v361_v17 = vor.u32 (!%p176_p9), %v360_v14, %v356_v13  ;;  %v369_v23 = vor.u32 (!%p176_p9), %v367_v21, %v365_v18  ;;  %s1123_s27 = scalar_lea.hbm (!%p176_p9), %s1169_s4, %s780_s13 }
  0x14   : > { %v373_v24 = vrot.slane (!%p176_p9), %v371_v22, 1  ;;  %v287_v31 = vrot.slane (!%p176_p9), %v222_v29, %v286_v30  ;;  %v426_v51 = vrot.slane (!%p176_p9), %v228_v49, %v425_v50 }
  0x15   : > { %s206_s29 = scalar_select %p205_p10, %s1022_s19, 3  ;;  %v366_v20 = vsel %vm354_vm4, %v361_v17, %v365_v18  ;;  %v560_v17 = vld [vmem:[%s1168_s3 + $0x20] sm:$0x1] }
  0x16   : > { %v374_v25 = vsel %vm354_vm4, %v369_v23, %v373_v24  ;;  %v561_v18 = vunpack.c.l.bf16 %v560_v17 }
  0x17   : > { %s783_s30 = sshll.u32 %s206_s29, 3  ;;  %s975_s29 = smov [#allocation2]  }
  0x18   : > { %s214_s7 = scalar_lea.vmem %s1166_s1, %s783_s30  ;;  %s209_s10 = scalar_lea.vmem %s1165_s0, %s783_s30 }
  0x19   : > { %v898_v3 = vld [vmem:[%s214_s7] sm:$0xff]   ;;  %s911_s30 = sshll.u32 %s975_s29, 4  ;;  %s912_s30 = int_to_ptr.vmem [resolvable:$false] %s911_s30 }
  0x1a   : > { %806 = vmatmul.mubr.msk.bf16.vlgmr.msra.gmra.mrb[0].mxu0 %vm234_vm2, %v898_v3  ;;  %v899_v9 = vld [vmem:[%s209_s10] sm:$0xff]   ;;  %s203_s10 = sand.u32 1, %s961_s16   ;;  %s913_s5 = scalar_lea.vmem %s912_s30, 32 }
  0x1b   : > { %819 = vmatprep.mubr.msk.bf16.mxu0 %vm972_vm1, %v971_v1  ;;  %816 = vmatpush3.bf16.msra.mxu0 %v366_v20  ;;  %s204_s14 = scalar_lea.vmem [#allocation2], %s203_s10  ;;  %s677_s28 = scalar_lea.sflag [#allocation3], %s203_s10 }
  0x1c   : > { %817 = vmatprep.subr.bf16.mxu0 %v971_v1  ;;  %s689_s20 = sshll.u32 %s204_s14, 4  ;;  %s1125_s20 = int_to_ptr.vmem [resolvable:$true] %s689_s20 }
  0x1d   : > { %s907_s19 = scalar_lea.vmem %s1125_s20, 16  ;;  %p914_p0 = scmp.lt.s32.totalorder %s1125_s20, %s912_s30 }
  0x1e   : > { %p908_p11 = scmp.ne.s32.totalorder %s1125_s20, %s907_s19  ;;  %p915_p1 = scmp.lt.s32.totalorder %s913_s5, %s907_s19 }
  0x1f   : > { %818 = vmatpush3.bf16.msra.mxu0 %v374_v25 }
  0x20   : > { %852 = vmatprep.subr.bf16.mxu0 %v973_v46  ;;  %p909_p12 = pnand %p908_p11, %p1039_p5  ;;  %p916_p2 = por %p915_p1, %p914_p0 }
  0x22   : > { %p910_p13 = pneg %p909_p12 }
  0x24   : > { %p917_p3 = pnand %p916_p2, %p910_p13 }
  0xed   : > { %v276_v4 = vpop.f32.mrb[0].mxu0 }
  0xee   : > { %v807_v5 = vpop.f32.mrb[1].mxu0 }
  0xef   : > { %v279_v6 = vpop.f32.mrb[2].mxu0 }
  0xf0   : > { %v283_v7 = vpack.c.bf16 %v279_v6, %v276_v4  ;;  %v808_v8 = vpop.f32.mrb[3].mxu0  ;;  %v974_v4 = vmov 0.0625  }
  0xf2   : > { %810 = vmatpush3.bf16.msra.mxu1 %v283_v7 }
  0xf3   : > { %823 = vmatprep.subr.bf16.mxu1 %v971_v1 }
  0xf5   : > { %812 = vmatmul.mubr.msk.bf16.vlgmr.msra.gmra.mrb[0].mxu1 %vm293_vm3, %v899_v9 }
  0xf6   : > { %825 = vmatprep.mubr.msk.bf16.mxu1 %vm972_vm1, %v971_v1 }
 0x1c8   : > { %v331_v32 = vpop.f32.mrb[0].mxu1 }
 0x1c9   : > { %v332_v33 = vadd.f32 %v331_v32, %v287_v31  ;;  %v813_v34 = vpop.f32.mrb[1].mxu1 }
 0x1ca   : > { %v334_v35 = vpop.f32.mrb[2].mxu1 }
 0x1cb   : > { %v335_v36 = vadd.f32 %v334_v35, %v287_v31  ;;  %v814_v37 = vpop.f32.mrb[3].mxu1  ;;  %v338_v38 = vmax.f32 %v332_v33, 0.0 }
 0x1cd   : > { %v339_v39 = vmax.f32 %v335_v36, 0.0 }
 0x1cf   : > { %v340_v40 = vpack.c.bf16 %v339_v39, %v338_v38 }
 0x1d1   : > { %820 = vmatmul.mubr.msk.bf16.vlgmr.msra.gmra.mrb[4].mxu0 %vm377_vm5, %v340_v40 }
 0x1d2   : > { %833 = vmatprep.mubr.msk.f32.mxu0 %vm972_vm1, %v971_v1 }
 0x2a4   : > { %v415_v41 = vpop.f32.mrb[4].mxu0 }
 0x2a5   : > { %v821_v42 = vpop.f32.mrb[5].mxu0 }
 0x2a6   : > { %v418_v43 = vpop.f32.mrb[6].mxu0 }
 0x2a7   : > { %v422_v44 = vpack.c.bf16 %v418_v43, %v415_v41  ;;  %v822_v45 = vpop.f32.mrb[7].mxu0 }
 0x2a9   : > { %824 = vmatpush3.bf16.msra.mxu1 %v422_v44 }
 0x2aa   : > { %836 = vmatprep.subr.bf16.mxu1 %v971_v1 }
 0x2ac   : > { %826 = vmatmul.mubr.msk.bf16.vlgmr.msra.gmra.mrb[4].mxu1 %vm293_vm3, %v899_v9 }
 0x2ad   : > { %840 = vmatprep.mubr.msk.bf16.mxu1 %vm972_vm1, %v971_v1  ;;  %837 = vmatpush3.bf16.msra.mxu1 %v903_v47 }
 0x2ae   : > { %838 = vmatprep.subr.bf16.mxu1 %v971_v1 }
 0x2b1   : > { %839 = vmatpush3.bf16.msra.mxu1 %v904_v48 }
 0x37f   : > { %v461_v52 = vpop.f32.mrb[4].mxu1 }
 0x380   : > { %v462_v53 = vadd.f32 %v461_v52, %v426_v51  ;;  %v827_v54 = vpop.f32.mrb[5].mxu1 }
 0x381   : > { %v464_v55 = vpop.f32.mrb[6].mxu1 }
 0x382   : > { %v468_v56 = vmax.f32 %v462_v53, 0.0  ;;  %v465_v57 = vadd.f32 %v464_v55, %v426_v51  ;;  %v828_v58 = vpop.f32.mrb[7].mxu1 }
 0x384   : > { %v469_v59 = vmax.f32 %v465_v57, 0.0  ;;  %v543_v60 = vsel %vm377_vm5, %v468_v56, -inf }
 0x386   : > { %v853_v61 = vpack.c.bf16 %v469_v59, %v468_v56  ;;  %v544_v62 = vsel %vm377_vm5, %v469_v59, -inf }
 0x387   : > { %v545_v63 = vmax.f32 %v543_v60, %v544_v62 }
 0x388   : > { %854 = vmatpush3.bf16.msra.mxu0 %v853_v61 }
 0x389   : > { %v546_v2 = vrot.slane %v545_v63, 4  ;;  %844 = vmatprep.subr.bf16.mxu0 %v971_v1 }
 0x38b   : > { %v547_v3 = vmax.f32 %v545_v63, %v546_v2  ;;  %834 = vmatmul.mubr.msk.f32.vlgmr.msra.gmra.mrb[8].mxu0 %vm293_vm3, %v974_v4 }
 0x38c   : > { %845 = vmatpush3.bf16.msra.mxu0 %v905_v0  ;;  %848 = vmatprep.mubr.msk.bf16.mxu0 %vm972_vm1, %v971_v1 }
 0x38d   : > { %v548_v5 = vrot.slane %v547_v3, 2  ;;  %846 = vmatprep.subr.bf16.mxu0 %v971_v1 }
 0x38f   : > { %v549_v6 = vmax.f32 %v547_v3, %v548_v5 }
 0x390   : > { %847 = vmatpush3.bf16.msra.mxu0 %v906_v10 }
 0x391   : > { %v550_v7 = vrot.slane %v549_v6, 1 }
 0x393   : > { %v551_v8 = vmax.f32 %v549_v6, %v550_v7 }
 0x395   : > { %v563_v9 = vpack.c.bf16 %v551_v8, %v551_v8 }
 0x397   : > { %841 = vmatmul.mubr.msk.bf16.vlgmr.msra.gmra.mrb[8].mxu1 %vm377_vm5, %v563_v9 }
 0x45e   : > { %v539_v11 = vpop.f32.mrb[8].mxu0 }
 0x45f   : > { %v562_v12 = vpack.c.bf16 %v539_v11, %v539_v11  ;;  %v835_v13 = vpop.f32.mrb[9].mxu0 }
 0x461   : > { %849 = vmatmul.mubr.msk.bf16.vlgmr.msra.gmra.mrb[12].mxu0 %vm377_vm5, %v562_v12 }
 0x46a   : > { %v613_v14 = vpop.f32.mrb[8].mxu1 }
 0x46b   : > { %v842_v1 = vpop.f32.mrb[9].mxu1 }
 0x46c   : > { %v616_v15 = vpop.f32.mrb[10].mxu1 }
 0x46d   : > { %v843_v16 = vpop.f32.mrb[11].mxu1 }
 0x534   : > { %v668_v19 = vpop.f32.mrb[12].mxu0 }
 0x535   : > { %v669_v20 = vadd.f32 %v668_v19, %v613_v14  ;;  %v850_v21 = vpop.f32.mrb[13].mxu0 }
 0x536   : > { %v671_v22 = vpop.f32.mrb[14].mxu0 }
 0x537   : > { %v674_v23 = vadd.f32 %v669_v20, %v561_v18  ;;  %v851_v24 = vpop.f32.mrb[15].mxu0 }
 0x539   : > { %675 = vst [vmem:[%s204_s14] sm:$0x1] %v674_v23 }
 0x53a   : > { %920 = shalt.err (!%p917_p3)
}
 0x53b   : > { %s921_s6 = scalar_lea.hbm %s1123_s27, 16  ;;  %s925_s9 = scalar_lea.hbm %s1169_s4, 64 }
 0x53c   : > { %p922_p4 = scmp.ne.s32.totalorder %s1123_s27, %s921_s6  ;;  %p926_p9 = scmp.lt.u32.totalorder %s1123_s27, %s1169_s4 }
 0x53d   : > { %p927_p10 = scmp.lt.u32.totalorder %s925_s9, %s921_s6  ;;  %p929_p12 = scmp.lt.u32.totalorder %s921_s6, %s1123_s27 }
 0x53e   : > { %p923_p7 = pnand %p922_p4, %p1039_p5 }
 0x53f   : > { %p928_p11 = por %p927_p10, %p926_p9 }
 0x540   : > { %p924_p8 = pneg %p923_p7 }
 0x541   : > { %p930_p13 = por %p929_p12, %p928_p11 }
 0x543   : > { %p931_p0 = pnand %p930_p13, %p924_p8 }
 0x545   : > { %934 = shalt.err (!%p931_p0)
}
 0x546   : > { %855 = dma.vmem_to_hbm [thread:$0]  (%p1039_p5), %s1125_s20, 16, %s1123_s27, %s677_s28  }
 0x547 PF: > { %p861_p1 = scmp.ge.s32.totalorder %s969_s18, 2  ;;  %s701_s12 = sand.u32 1, %s957_s15  }
 0x548   : > { %s702_s13 = scalar_lea.sflag [#allocation3], %s701_s12 }
 0x549   : > { %p858_p2 = pnand %p861_p1, %p1043_p6 }
 0x54b   : > { %952 = dma.done.wait (!%p858_p2), %s702_s13, 16  }
 0x54c   : > { %954 = vsyncadd (!%p858_p2), %s702_s13, 4294967280  ;;  %p14_p3 = scmp.ge.s32.totalorder %s1026_s21, 6   ;;  %s1172_s15 = smov %s961_s16 }
 0x54d   : > { %s1173_s16 = smov %s965_s17  ;;  %s1174_s17 = smov %s1037_s24 }
 0x54e   : > { %s1175_s18 = smov %s1026_s21  ;;  %16 = sbr.rel (!%p14_p3) target bundleno = 3 (0x3), region = 74 }
 0x555   :  { %706 = vsyncpa [#allocation3], 1 }
 0x556   :  { %708 = vsyncpa [#allocation3 + $0x1], 1 }

</bundles_post_ra>
